<compile_context>
chip_gen: v6e
topology: v6e:2x2x1
jax: 0.10.0
libtpu: 0.0.40
codegen_flags: <defaults>
</compile_context>

<pallas_src>
import functools

import numpy as np

import jax
import jax.numpy as jnp
from jax.experimental import pallas as pl
from jax.experimental.pallas import tpu as pltpu

BN_EPS = 1e-5
LANE = 128      # TPU lane width (last-dim tile)
SUBLANE = 8     # f32 sublane tile (second-to-last dim)


def _round_up(v, m):
    return ((v + m - 1) // m) * m


# ---------------------------------------------------------------------------
# Kernel
# ---------------------------------------------------------------------------
def mg2_kernel(x_ref, w1_ref, wmid_ref, w6_ref, vec_ref, o_ref, *, batch):
    """Fused MG2_transformer forward on zero-padded, lane-dense tiles.

    x_ref   : (B_pad, in_pad)              f32
    w1_ref  : (in_pad, n_pad)              MXU operand dtype (bf16 default)
    wmid_ref: banded:   (n_pad, n_pad)     single merged Gauss_lin2..5 matrix
              fallback: (4, n_pad, n_pad)  stacked Gauss_lin2..5
    w6_ref  : banded:   (n_pad, out_pad)   lane-band packed Gauss_lin6
              fallback: (5*n_pad, out_pad)
    vec_ref : (24, max(n_pad, out_pad))    f32
              rows 0..4 = b1..b5, row 5 = b6, rows 6..10 = gamma1..5,
              rows 11..15 = beta1..5, row 16 = head component code
              (0/1/2 for valid output lanes, -1 for padding).
    o_ref   : (B_pad, out_pad)             f32
    """
    f32 = jnp.float32
    B_pad = x_ref.shape[0]
    n_pad = w1_ref.shape[1]
    out_pad = o_ref.shape[1]
    mxu_dtype = w1_ref.dtype
    # Lane-band packing is flagged purely by the host-side w6 shape.
    banded = (w6_ref.shape[0] == n_pad)

    inv_b = f32(1.0 / batch)

    # Padded batch rows must not contaminate the BatchNorm statistics.
    if B_pad != batch:
        row_ids = jax.lax.broadcasted_iota(jnp.int32, (B_pad, 1), 0)
        row_mask = (row_ids < batch).astype(f32)
    else:
        row_mask = None

    def linear_relu_bn(inp_mxu, w, b, gamma, beta):
        # Linear (MXU, f32 accumulate) + bias.  w / inp are already mxu_dtype.
        y = jnp.dot(inp_mxu, w, preferred_element_type=f32) + b
        # ReLU.
        y = jnp.maximum(y, 0.0)
        # TODO(synk): dropout skipped (module default p=0.0).
        # BatchNorm1d, training-mode batch stats, two-pass variance; fold
        # gamma*rsqrt(var+eps) into one scale/shift multiply-add.  Pad lanes
        # have gamma == beta == 0, so they stay exactly zero.
        ym = y if row_mask is None else y * row_mask
        mean = jnp.sum(ym, axis=0, keepdims=True) * inv_b
        d = (y - mean) if row_mask is None else (y - mean) * row_mask
        var = jnp.sum(d * d, axis=0, keepdims=True) * inv_b
        scale = gamma * jax.lax.rsqrt(var + BN_EPS)
        shift = beta - mean * scale
        return y * scale + shift

    if banded:
        w_mid = wmid_ref[...]        # one shared (n_pad, n_pad) slab, loaded once

    # ----- Gauss basis: 5 x (Linear -> ReLU -> BN).  One mxu-dtype cast per
    # layer output; everything else stays f32.
    inp = x_ref[...].astype(mxu_dtype)
    ys = []
    for l in range(5):
        if l == 0:
            w = w1_ref[...]
        elif banded:
            w = w_mid
        else:
            w = wmid_ref[l - 1]
        y = linear_relu_bn(inp,
                           w,
                           vec_ref[l:l + 1, :n_pad],
                           vec_ref[6 + l:7 + l, :n_pad],
                           vec_ref[11 + l:12 + l, :n_pad])
        if l < 4:
            inp = y.astype(mxu_dtype)
        ys.append(y)

    # ----- concat(y1..y5): in banded mode each y_l lives in its own disjoint
    # 16-lane band, so the concat is a plain sum (no lane movement, no scratch).
    if banded:
        cat = ys[0] + ys[1] + ys[2] + ys[3] + ys[4]
    else:
        cat = jnp.concatenate(ys, axis=1)

    # ----- Gauss_lin6: one MXU matmul (K = 128 in banded mode).
    b6 = vec_ref[5:6, :out_pad]
    y6 = jnp.dot(cat.astype(mxu_dtype), w6_ref[...],
                 preferred_element_type=f32) + b6

    # ----- Head (weights=True): view(B, outDim//3, 3), then
    # [:, :, 0] identity, [:, :, 1] abs, [:, :, 2] softmax over dim=1.
    # Component codes are a (1, out_pad) lane vector shipped in the param slab
    # (no captured constants, no in-kernel iota/mod, implicit row broadcast).
    comp = vec_ref[16:17, :out_pad]
    is_abs = comp == 1.0
    is_sm = comp == 2.0

    y6 = jnp.where(is_abs, jnp.abs(y6), y6)

    m = jnp.max(jnp.where(is_sm, y6, f32(-1e30)), axis=1, keepdims=True)
    z = jnp.where(is_sm, y6 - m, 0.0)
    e = jnp.where(is_sm, jnp.exp(z), 0.0)
    denom = jnp.sum(e, axis=1, keepdims=True)
    # Exact per-row reciprocal (pl.reciprocal(approx=True) would move this to
    # the EUP slot, but exact division keeps strict parity with PyTorch f32).
    y6 = jnp.where(is_sm, e * (1.0 / denom), y6)
    # TODO(synk): weights=False head (abs-only, outDim==2 flatten) not
    # implemented; module defaults use weights=True.

    o_ref[...] = y6.astype(o_ref.dtype)


# ---------------------------------------------------------------------------
# Wrapper
# ---------------------------------------------------------------------------
@functools.partial(jax.jit, static_argnames=("out_dim",))
def mg2_forward(x, w1p, wmid, w6p, vecs, *, out_dim):
    """Fused MG2_transformer forward. Returns (B, out_dim // 3, 3) f32."""
    assert out_dim % 3 == 0, "weights=True head requires outDim % 3 == 0"
    B, in_dim = x.shape
    in_pad, n_pad = w1p.shape
    out_pad = w6p.shape[1]
    B_pad = _round_up(B, SUBLANE)

    x_pad = jnp.pad(x.astype(jnp.float32),
                    ((0, B_pad - B), (0, in_pad - in_dim)))
    inputs = (x_pad, w1p, wmid, w6p, vecs)

    # Generation-aware VMEM budget (v7x only has 64 MiB per TensorCore).
    in_bytes = sum(int(np.prod(a.shape)) * jnp.dtype(a.dtype).itemsize
                   for a in inputs)
    out_bytes = B_pad * out_pad * 4
    act_bytes = 8 * B_pad * n_pad * 4
    try:
        phys_vmem = int(pltpu.get_tpu_info().vmem_capacity_bytes)
    except Exception:
        phys_vmem = 64 * 1024 * 1024            # conservative (v7x per-core)
    vmem_ceiling = max(16 * 1024 * 1024, phys_vmem - 8 * 1024 * 1024)
    vmem_limit = int(min(vmem_ceiling,
                         max(32 * 1024 * 1024,
                             4 * (in_bytes + out_bytes + act_bytes))))

    k6 = w6p.shape[0]
    flops = 2 * B_pad * (in_pad * n_pad + 4 * n_pad * n_pad + k6 * out_pad)
    cost = pl.CostEstimate(flops=int(flops),
                           transcendentals=int(5 * n_pad + B_pad * out_pad),
                           bytes_accessed=int(in_bytes + out_bytes))

    vmem_spec = pl.BlockSpec(memory_space=pltpu.MemorySpace.VMEM)
    kernel = functools.partial(mg2_kernel, batch=B)

    # TODO(synk): for large B, add a batch grid (B tiles of 512-1024 rows),
    # mark the B axis "arbitrary" and accumulate per-layer sum / sum-of-squares
    # across grid steps for a two-pass full-batch BatchNorm; give all weight
    # BlockSpecs index_map `lambda i: (0, 0)` so the slabs stay VMEM-resident
    # instead of being re-DMA'd per tile (re-derive the tile ceiling for v7x's
    # 64 MiB VMEM).  At small B a single fused invocation is correct & fastest.
    # TODO(synk): when this forward runs repeatedly with fixed weights, hide
    # the ~100 KiB weight DMA with a cross-pallas_call prefetch future
    # (SEMAPHORE/VMEM outputs consumed by the next call).
    out_full = pl.pallas_call(
        kernel,
        out_shape=jax.ShapeDtypeStruct((B_pad, out_pad), jnp.float32),
        in_specs=[vmem_spec] * len(inputs),
        out_specs=vmem_spec,
        compiler_params=pltpu.CompilerParams(vmem_limit_bytes=vmem_limit),
        cost_estimate=cost,
    )(*inputs)

    return out_full[:B, :out_dim].reshape(B, out_dim // 3, 3)


# ---------------------------------------------------------------------------
# Parameter construction / packing
# ---------------------------------------------------------------------------
def init_params(key, in_dim, out_dim, n_latent):
    """PyTorch-Linear-style init. Weights stored as (in_features, out_features)."""
    def linear(k, fan_in, fan_out):
        kw, kb = jax.random.split(k)
        bound = 1.0 / jnp.sqrt(fan_in)
        w = jax.random.uniform(kw, (fan_in, fan_out), jnp.float32, -bound, bound)
        b = jax.random.uniform(kb, (1, fan_out), jnp.float32, -bound, bound)
        return w, b

    keys = jax.random.split(key, 6)
    w1, b1 = linear(keys[0], in_dim, n_latent)
    w2, b2 = linear(keys[1], n_latent, n_latent)
    w3, b3 = linear(keys[2], n_latent, n_latent)
    w4, b4 = linear(keys[3], n_latent, n_latent)
    w5, b5 = linear(keys[4], n_latent, n_latent)
    w6, b6 = linear(keys[5], n_latent * 5, out_dim)

    gamma = jnp.ones((1, n_latent), jnp.float32)    # fresh BatchNorm1d affine
    beta = jnp.zeros((1, n_latent), jnp.float32)
    return (w1, b1, w2, b2, w3, b3, w4, b4, w5, b5, w6, b6,
            gamma, beta, gamma, beta, gamma, beta, gamma, beta, gamma, beta)


def pack_params(params, in_dim, out_dim, n_latent, mxu_dtype=jnp.bfloat16):
    """Pack the 23 small tensors into 4 lane-padded slabs (one DMA each).

    bf16 MXU operands by default on every TPU generation (matmul inputs only;
    all BN / elementwise math stays f32 inside the kernel).

    When 5*n_latent <= 128 ("banded" mode), layer l's parameters are placed in
    lane band [l*n_latent, (l+1)*n_latent): the four middle weight matrices
    merge into one (128, 128) slab, w6 shrinks to (128, out_pad), and
    concat(y1..y5) becomes a plain sum inside the kernel.
    """
    (w1, b1, w2, b2, w3, b3, w4, b4, w5, b5, w6, b6,
     g1, be1, g2, be2, g3, be3, g4, be4, g5, be5) = params

    n_pad = _round_up(n_latent, LANE)
    in_pad = _round_up(in_dim, LANE)
    out_pad = _round_up(out_dim, LANE)
    vw = max(n_pad, out_pad)
    banded = (5 * n_latent <= LANE)          # implies n_pad == LANE
    offs = [(l * n_latent if banded else 0) for l in range(5)]

    w1p = jnp.zeros((in_pad, n_pad), jnp.float32)
    w1p = w1p.at[:in_dim, offs[0]:offs[0] + n_latent].set(w1)

    mids = (w2, w3, w4, w5)
    if banded:
        # Disjoint row/col bands -> all four middle layers share one matrix.
        wmid = jnp.zeros((n_pad, n_pad), jnp.float32)
        for i, w in enumerate(mids):         # layer i+1: rows band i, cols band i+1
            wmid = wmid.at[offs[i]:offs[i] + n_latent,
                           offs[i + 1]:offs[i + 1] + n_latent].set(w)
        w6p = jnp.zeros((n_pad, out_pad), jnp.float32)
        w6p = w6p.at[:5 * n_latent, :out_dim].set(w6)
    else:
        wmid = jnp.zeros((4, n_pad, n_pad), jnp.float32)
        for i, w in enumerate(mids):
            wmid = wmid.at[i, :n_latent, :n_latent].set(w)
        w6p = jnp.zeros((5 * n_pad, out_pad), jnp.float32)
        for i in range(5):
            w6p = w6p.at[i * n_pad:i * n_pad + n_latent, :out_dim].set(
                w6[i * n_latent:(i + 1) * n_latent, :])

    vecs = jnp.zeros((24, vw), jnp.float32)
    for i, b in enumerate((b1, b2, b3, b4, b5)):
        vecs = vecs.at[i, offs[i]:offs[i] + n_latent].set(b[0])
    vecs = vecs.at[5, :out_dim].set(b6[0])
    for i, g in enumerate((g1, g2, g3, g4, g5)):
        vecs = vecs.at[6 + i, offs[i]:offs[i] + n_latent].set(g[0])   # pad gamma=0
    for i, be in enumerate((be1, be2, be3, be4, be5)):
        vecs = vecs.at[11 + i, offs[i]:offs[i] + n_latent].set(be[0])
    # Row 16: head component code (j % 3 for valid output lanes, -1 for pads).
    comp_row = np.full((vw,), -1.0, np.float32)
    comp_row[:out_dim] = (np.arange(out_dim) % 3).astype(np.float32)
    vecs = vecs.at[16, :].set(jnp.asarray(comp_row))

    return (w1p.astype(mxu_dtype), wmid.astype(mxu_dtype),
            w6p.astype(mxu_dtype), vecs)


# ---------------------------------------------------------------------------
# Pure-JAX reference (mirrors the PyTorch module forward, f32)
# ---------------------------------------------------------------------------
def reference_forward(x, params, out_dim):
    (w1, b1, w2, b2, w3, b3, w4, b4, w5, b5, w6, b6,
     g1, be1, g2, be2, g3, be3, g4, be4, g5, be5) = params

    def block(inp, w, b, g, be):
        y = jnp.maximum(inp @ w + b, 0.0)
        mean = jnp.mean(y, axis=0, keepdims=True)
        var = jnp.mean((y - mean) ** 2, axis=0, keepdims=True)   # biased (train mode)
        return g * (y - mean) / jnp.sqrt(var + BN_EPS) + be

    y1 = block(x, w1, b1, g1, be1)
    y2 = block(y1, w2, b2, g2, be2)
    y3 = block(y2, w3, b3, g3, be3)
    y4 = block(y3, w4, b4, g4, be4)
    y5 = block(y4, w5, b5, g5, be5)
    y = jnp.concatenate((y1, y2, y3, y4, y5), axis=1) @ w6 + b6
    y = y.reshape(-1, out_dim // 3, 3)
    return jnp.concatenate(
        (y[:, :, 0:1],
         jnp.abs(y[:, :, 1:2]),
         jax.nn.softmax(y[:, :, 2:3], axis=1)),
        axis=2)


# ---------------------------------------------------------------------------
if __name__ == "__main__":
    # Module defaults: N_latent=16, weights=True, p=0.0, bn=True.
    B, IN_DIM, OUT_DIM, N_LATENT = 8, 16, 12, 16

    key = jax.random.PRNGKey(0)
    kx, kp = jax.random.split(key)
    x = jax.random.normal(kx, (B, IN_DIM), jnp.float32)
    params = init_params(kp, IN_DIM, OUT_DIM, N_LATENT)
    ref = reference_forward(x, params, OUT_DIM)

    # f32 MXU operands: strict parity with the PyTorch f32 forward.
    packed_f32 = pack_params(params, IN_DIM, OUT_DIM, N_LATENT,
                             mxu_dtype=jnp.float32)
    out_f32 = jax.block_until_ready(mg2_forward(x, *packed_f32, out_dim=OUT_DIM))
    assert out_f32.shape == (B, OUT_DIM // 3, 3)
    max_err = float(jnp.max(jnp.abs(out_f32 - ref)))
    assert jnp.allclose(out_f32, ref, atol=2e-3, rtol=2e-3), f"max|err|={max_err}"

    # Default packing: bf16 MXU operands on all generations (weight DMA halved);
    # BN / elementwise math stays f32 inside the kernel.  Looser numeric check.
    packed_bf16 = pack_params(params, IN_DIM, OUT_DIM, N_LATENT)
    out_bf16 = jax.block_until_ready(mg2_forward(x, *packed_bf16, out_dim=OUT_DIM))
    assert out_bf16.shape == (B, OUT_DIM // 3, 3)
    assert bool(jnp.all(jnp.isfinite(out_bf16)))

    print("KERNEL_OK")
</pallas_src>

<mosaic_0001>
module attributes {stable_mosaic.version = 11 : i64} {
  func.func @mg2_kernel(%arg0: memref<8x128xf32, #tpu.memory_space<vmem>>, %arg1: memref<128x128xf32, #tpu.memory_space<vmem>>, %arg2: memref<128x128xf32, #tpu.memory_space<vmem>>, %arg3: memref<128x128xf32, #tpu.memory_space<vmem>>, %arg4: memref<24x128xf32, #tpu.memory_space<vmem>>, %arg5: memref<8x128xf32, #tpu.memory_space<vmem>>) attributes {dimension_semantics = [], scalar_prefetch = 0 : i64, scratch_operands = 0 : i64, tpu.core_type = #tpu.core_type<tc>} {
    %c0 = arith.constant 0 : index
    %c0_0 = arith.constant 0 : index
    %0 = vector.load %arg2[%c0, %c0_0] : memref<128x128xf32, #tpu.memory_space<vmem>>, vector<128x128xf32>
    %c0_1 = arith.constant 0 : index
    %c0_2 = arith.constant 0 : index
    %1 = vector.load %arg0[%c0_1, %c0_2] : memref<8x128xf32, #tpu.memory_space<vmem>>, vector<8x128xf32>
    %c0_3 = arith.constant 0 : index
    %c0_4 = arith.constant 0 : index
    %2 = vector.load %arg1[%c0_3, %c0_4] : memref<128x128xf32, #tpu.memory_space<vmem>>, vector<128x128xf32>
    %c0_5 = arith.constant 0 : index
    %c0_6 = arith.constant 0 : index
    %3 = vector.load %arg4[%c0_5, %c0_6] : memref<24x128xf32, #tpu.memory_space<vmem>>, vector<1x128xf32>
    %c6 = arith.constant 6 : index
    %c0_7 = arith.constant 0 : index
    %4 = vector.load %arg4[%c6, %c0_7] : memref<24x128xf32, #tpu.memory_space<vmem>>, vector<1x128xf32>
    %c11 = arith.constant 11 : index
    %c0_8 = arith.constant 0 : index
    %5 = vector.load %arg4[%c11, %c0_8] : memref<24x128xf32, #tpu.memory_space<vmem>>, vector<1x128xf32>
    %cst = arith.constant dense<0.000000e+00> : vector<8x128xf32>
    %6 = tpu.matmul %1, %2, %cst {dimension_numbers = #tpu.dot_dimension_numbers<[1], [0], [0], [1], [0, 0, 1, 1], [], []>} : vector<8x128xf32>, vector<128x128xf32>, vector<8x128xf32> -> vector<8x128xf32>
    %7 = vector.broadcast %3 : vector<1x128xf32> to vector<8x128xf32>
    %8 = arith.addf %6, %7 : vector<8x128xf32>
    %cst_9 = arith.constant 0.000000e+00 : f32
    %9 = vector.broadcast %cst_9 : f32 to vector<8x128xf32>
    %10 = arith.maximumf %8, %9 : vector<8x128xf32>
    %cst_10 = arith.constant dense<0.000000e+00> : vector<128xf32>
    %11 = vector.multi_reduction <add>, %10, %cst_10 [0] : vector<8x128xf32> to vector<128xf32>
    %12 = vector.shape_cast %11 : vector<128xf32> to vector<1x128xf32>
    %cst_11 = arith.constant 1.250000e-01 : f32
    %13 = vector.broadcast %cst_11 : f32 to vector<1x128xf32>
    %14 = arith.mulf %12, %13 : vector<1x128xf32>
    %15 = vector.broadcast %14 : vector<1x128xf32> to vector<8x128xf32>
    %16 = arith.subf %10, %15 : vector<8x128xf32>
    %17 = arith.mulf %16, %16 : vector<8x128xf32>
    %cst_12 = arith.constant dense<0.000000e+00> : vector<128xf32>
    %18 = vector.multi_reduction <add>, %17, %cst_12 [0] : vector<8x128xf32> to vector<128xf32>
    %19 = vector.shape_cast %18 : vector<128xf32> to vector<1x128xf32>
    %cst_13 = arith.constant 1.250000e-01 : f32
    %20 = vector.broadcast %cst_13 : f32 to vector<1x128xf32>
    %21 = arith.mulf %19, %20 : vector<1x128xf32>
    %cst_14 = arith.constant 9.99999974E-6 : f32
    %22 = vector.broadcast %cst_14 : f32 to vector<1x128xf32>
    %23 = arith.addf %21, %22 : vector<1x128xf32>
    %24 = math.rsqrt %23 : vector<1x128xf32>
    %25 = arith.mulf %4, %24 : vector<1x128xf32>
    %26 = arith.mulf %14, %25 : vector<1x128xf32>
    %27 = arith.subf %5, %26 : vector<1x128xf32>
    %28 = vector.broadcast %25 : vector<1x128xf32> to vector<8x128xf32>
    %29 = arith.mulf %10, %28 : vector<8x128xf32>
    %30 = vector.broadcast %27 : vector<1x128xf32> to vector<8x128xf32>
    %31 = arith.addf %29, %30 : vector<8x128xf32>
    %c1 = arith.constant 1 : index
    %c0_15 = arith.constant 0 : index
    %32 = vector.load %arg4[%c1, %c0_15] : memref<24x128xf32, #tpu.memory_space<vmem>>, vector<1x128xf32>
    %c7 = arith.constant 7 : index
    %c0_16 = arith.constant 0 : index
    %33 = vector.load %arg4[%c7, %c0_16] : memref<24x128xf32, #tpu.memory_space<vmem>>, vector<1x128xf32>
    %c12 = arith.constant 12 : index
    %c0_17 = arith.constant 0 : index
    %34 = vector.load %arg4[%c12, %c0_17] : memref<24x128xf32, #tpu.memory_space<vmem>>, vector<1x128xf32>
    %cst_18 = arith.constant dense<0.000000e+00> : vector<8x128xf32>
    %35 = tpu.matmul %31, %0, %cst_18 {dimension_numbers = #tpu.dot_dimension_numbers<[1], [0], [0], [1], [0, 0, 1, 1], [], []>} : vector<8x128xf32>, vector<128x128xf32>, vector<8x128xf32> -> vector<8x128xf32>
    %36 = vector.broadcast %32 : vector<1x128xf32> to vector<8x128xf32>
    %37 = arith.addf %35, %36 : vector<8x128xf32>
    %cst_19 = arith.constant 0.000000e+00 : f32
    %38 = vector.broadcast %cst_19 : f32 to vector<8x128xf32>
    %39 = arith.maximumf %37, %38 : vector<8x128xf32>
    %cst_20 = arith.constant dense<0.000000e+00> : vector<128xf32>
    %40 = vector.multi_reduction <add>, %39, %cst_20 [0] : vector<8x128xf32> to vector<128xf32>
    %41 = vector.shape_cast %40 : vector<128xf32> to vector<1x128xf32>
    %cst_21 = arith.constant 1.250000e-01 : f32
    %42 = vector.broadcast %cst_21 : f32 to vector<1x128xf32>
    %43 = arith.mulf %41, %42 : vector<1x128xf32>
    %44 = vector.broadcast %43 : vector<1x128xf32> to vector<8x128xf32>
    %45 = arith.subf %39, %44 : vector<8x128xf32>
    %46 = arith.mulf %45, %45 : vector<8x128xf32>
    %cst_22 = arith.constant dense<0.000000e+00> : vector<128xf32>
    %47 = vector.multi_reduction <add>, %46, %cst_22 [0] : vector<8x128xf32> to vector<128xf32>
    %48 = vector.shape_cast %47 : vector<128xf32> to vector<1x128xf32>
    %cst_23 = arith.constant 1.250000e-01 : f32
    %49 = vector.broadcast %cst_23 : f32 to vector<1x128xf32>
    %50 = arith.mulf %48, %49 : vector<1x128xf32>
    %cst_24 = arith.constant 9.99999974E-6 : f32
    %51 = vector.broadcast %cst_24 : f32 to vector<1x128xf32>
    %52 = arith.addf %50, %51 : vector<1x128xf32>
    %53 = math.rsqrt %52 : vector<1x128xf32>
    %54 = arith.mulf %33, %53 : vector<1x128xf32>
    %55 = arith.mulf %43, %54 : vector<1x128xf32>
    %56 = arith.subf %34, %55 : vector<1x128xf32>
    %57 = vector.broadcast %54 : vector<1x128xf32> to vector<8x128xf32>
    %58 = arith.mulf %39, %57 : vector<8x128xf32>
    %59 = vector.broadcast %56 : vector<1x128xf32> to vector<8x128xf32>
    %60 = arith.addf %58, %59 : vector<8x128xf32>
    %c2 = arith.constant 2 : index
    %c0_25 = arith.constant 0 : index
    %61 = vector.load %arg4[%c2, %c0_25] : memref<24x128xf32, #tpu.memory_space<vmem>>, vector<1x128xf32>
    %c8 = arith.constant 8 : index
    %c0_26 = arith.constant 0 : index
    %62 = vector.load %arg4[%c8, %c0_26] : memref<24x128xf32, #tpu.memory_space<vmem>>, vector<1x128xf32>
    %c13 = arith.constant 13 : index
    %c0_27 = arith.constant 0 : index
    %63 = vector.load %arg4[%c13, %c0_27] : memref<24x128xf32, #tpu.memory_space<vmem>>, vector<1x128xf32>
    %cst_28 = arith.constant dense<0.000000e+00> : vector<8x128xf32>
    %64 = tpu.matmul %60, %0, %cst_28 {dimension_numbers = #tpu.dot_dimension_numbers<[1], [0], [0], [1], [0, 0, 1, 1], [], []>} : vector<8x128xf32>, vector<128x128xf32>, vector<8x128xf32> -> vector<8x128xf32>
    %65 = vector.broadcast %61 : vector<1x128xf32> to vector<8x128xf32>
    %66 = arith.addf %64, %65 : vector<8x128xf32>
    %cst_29 = arith.constant 0.000000e+00 : f32
    %67 = vector.broadcast %cst_29 : f32 to vector<8x128xf32>
    %68 = arith.maximumf %66, %67 : vector<8x128xf32>
    %cst_30 = arith.constant dense<0.000000e+00> : vector<128xf32>
    %69 = vector.multi_reduction <add>, %68, %cst_30 [0] : vector<8x128xf32> to vector<128xf32>
    %70 = vector.shape_cast %69 : vector<128xf32> to vector<1x128xf32>
    %cst_31 = arith.constant 1.250000e-01 : f32
    %71 = vector.broadcast %cst_31 : f32 to vector<1x128xf32>
    %72 = arith.mulf %70, %71 : vector<1x128xf32>
    %73 = vector.broadcast %72 : vector<1x128xf32> to vector<8x128xf32>
    %74 = arith.subf %68, %73 : vector<8x128xf32>
    %75 = arith.mulf %74, %74 : vector<8x128xf32>
    %cst_32 = arith.constant dense<0.000000e+00> : vector<128xf32>
    %76 = vector.multi_reduction <add>, %75, %cst_32 [0] : vector<8x128xf32> to vector<128xf32>
    %77 = vector.shape_cast %76 : vector<128xf32> to vector<1x128xf32>
    %cst_33 = arith.constant 1.250000e-01 : f32
    %78 = vector.broadcast %cst_33 : f32 to vector<1x128xf32>
    %79 = arith.mulf %77, %78 : vector<1x128xf32>
    %cst_34 = arith.constant 9.99999974E-6 : f32
    %80 = vector.broadcast %cst_34 : f32 to vector<1x128xf32>
    %81 = arith.addf %79, %80 : vector<1x128xf32>
    %82 = math.rsqrt %81 : vector<1x128xf32>
    %83 = arith.mulf %62, %82 : vector<1x128xf32>
    %84 = arith.mulf %72, %83 : vector<1x128xf32>
    %85 = arith.subf %63, %84 : vector<1x128xf32>
    %86 = vector.broadcast %83 : vector<1x128xf32> to vector<8x128xf32>
    %87 = arith.mulf %68, %86 : vector<8x128xf32>
    %88 = vector.broadcast %85 : vector<1x128xf32> to vector<8x128xf32>
    %89 = arith.addf %87, %88 : vector<8x128xf32>
    %c3 = arith.constant 3 : index
    %c0_35 = arith.constant 0 : index
    %90 = vector.load %arg4[%c3, %c0_35] : memref<24x128xf32, #tpu.memory_space<vmem>>, vector<1x128xf32>
    %c9 = arith.constant 9 : index
    %c0_36 = arith.constant 0 : index
    %91 = vector.load %arg4[%c9, %c0_36] : memref<24x128xf32, #tpu.memory_space<vmem>>, vector<1x128xf32>
    %c14 = arith.constant 14 : index
    %c0_37 = arith.constant 0 : index
    %92 = vector.load %arg4[%c14, %c0_37] : memref<24x128xf32, #tpu.memory_space<vmem>>, vector<1x128xf32>
    %cst_38 = arith.constant dense<0.000000e+00> : vector<8x128xf32>
    %93 = tpu.matmul %89, %0, %cst_38 {dimension_numbers = #tpu.dot_dimension_numbers<[1], [0], [0], [1], [0, 0, 1, 1], [], []>} : vector<8x128xf32>, vector<128x128xf32>, vector<8x128xf32> -> vector<8x128xf32>
    %94 = vector.broadcast %90 : vector<1x128xf32> to vector<8x128xf32>
    %95 = arith.addf %93, %94 : vector<8x128xf32>
    %cst_39 = arith.constant 0.000000e+00 : f32
    %96 = vector.broadcast %cst_39 : f32 to vector<8x128xf32>
    %97 = arith.maximumf %95, %96 : vector<8x128xf32>
    %cst_40 = arith.constant dense<0.000000e+00> : vector<128xf32>
    %98 = vector.multi_reduction <add>, %97, %cst_40 [0] : vector<8x128xf32> to vector<128xf32>
    %99 = vector.shape_cast %98 : vector<128xf32> to vector<1x128xf32>
    %cst_41 = arith.constant 1.250000e-01 : f32
    %100 = vector.broadcast %cst_41 : f32 to vector<1x128xf32>
    %101 = arith.mulf %99, %100 : vector<1x128xf32>
    %102 = vector.broadcast %101 : vector<1x128xf32> to vector<8x128xf32>
    %103 = arith.subf %97, %102 : vector<8x128xf32>
    %104 = arith.mulf %103, %103 : vector<8x128xf32>
    %cst_42 = arith.constant dense<0.000000e+00> : vector<128xf32>
    %105 = vector.multi_reduction <add>, %104, %cst_42 [0] : vector<8x128xf32> to vector<128xf32>
    %106 = vector.shape_cast %105 : vector<128xf32> to vector<1x128xf32>
    %cst_43 = arith.constant 1.250000e-01 : f32
    %107 = vector.broadcast %cst_43 : f32 to vector<1x128xf32>
    %108 = arith.mulf %106, %107 : vector<1x128xf32>
    %cst_44 = arith.constant 9.99999974E-6 : f32
    %109 = vector.broadcast %cst_44 : f32 to vector<1x128xf32>
    %110 = arith.addf %108, %109 : vector<1x128xf32>
    %111 = math.rsqrt %110 : vector<1x128xf32>
    %112 = arith.mulf %91, %111 : vector<1x128xf32>
    %113 = arith.mulf %101, %112 : vector<1x128xf32>
    %114 = arith.subf %92, %113 : vector<1x128xf32>
    %115 = vector.broadcast %112 : vector<1x128xf32> to vector<8x128xf32>
    %116 = arith.mulf %97, %115 : vector<8x128xf32>
    %117 = vector.broadcast %114 : vector<1x128xf32> to vector<8x128xf32>
    %118 = arith.addf %116, %117 : vector<8x128xf32>
    %c4 = arith.constant 4 : index
    %c0_45 = arith.constant 0 : index
    %119 = vector.load %arg4[%c4, %c0_45] : memref<24x128xf32, #tpu.memory_space<vmem>>, vector<1x128xf32>
    %c10 = arith.constant 10 : index
    %c0_46 = arith.constant 0 : index
    %120 = vector.load %arg4[%c10, %c0_46] : memref<24x128xf32, #tpu.memory_space<vmem>>, vector<1x128xf32>
    %c15 = arith.constant 15 : index
    %c0_47 = arith.constant 0 : index
    %121 = vector.load %arg4[%c15, %c0_47] : memref<24x128xf32, #tpu.memory_space<vmem>>, vector<1x128xf32>
    %cst_48 = arith.constant dense<0.000000e+00> : vector<8x128xf32>
    %122 = tpu.matmul %118, %0, %cst_48 {dimension_numbers = #tpu.dot_dimension_numbers<[1], [0], [0], [1], [0, 0, 1, 1], [], []>} : vector<8x128xf32>, vector<128x128xf32>, vector<8x128xf32> -> vector<8x128xf32>
    %123 = vector.broadcast %119 : vector<1x128xf32> to vector<8x128xf32>
    %124 = arith.addf %122, %123 : vector<8x128xf32>
    %cst_49 = arith.constant 0.000000e+00 : f32
    %125 = vector.broadcast %cst_49 : f32 to vector<8x128xf32>
    %126 = arith.maximumf %124, %125 : vector<8x128xf32>
    %cst_50 = arith.constant dense<0.000000e+00> : vector<128xf32>
    %127 = vector.multi_reduction <add>, %126, %cst_50 [0] : vector<8x128xf32> to vector<128xf32>
    %128 = vector.shape_cast %127 : vector<128xf32> to vector<1x128xf32>
    %cst_51 = arith.constant 1.250000e-01 : f32
    %129 = vector.broadcast %cst_51 : f32 to vector<1x128xf32>
    %130 = arith.mulf %128, %129 : vector<1x128xf32>
    %131 = vector.broadcast %130 : vector<1x128xf32> to vector<8x128xf32>
    %132 = arith.subf %126, %131 : vector<8x128xf32>
    %133 = arith.mulf %132, %132 : vector<8x128xf32>
    %cst_52 = arith.constant dense<0.000000e+00> : vector<128xf32>
    %134 = vector.multi_reduction <add>, %133, %cst_52 [0] : vector<8x128xf32> to vector<128xf32>
    %135 = vector.shape_cast %134 : vector<128xf32> to vector<1x128xf32>
    %cst_53 = arith.constant 1.250000e-01 : f32
    %136 = vector.broadcast %cst_53 : f32 to vector<1x128xf32>
    %137 = arith.mulf %135, %136 : vector<1x128xf32>
    %cst_54 = arith.constant 9.99999974E-6 : f32
    %138 = vector.broadcast %cst_54 : f32 to vector<1x128xf32>
    %139 = arith.addf %137, %138 : vector<1x128xf32>
    %140 = math.rsqrt %139 : vector<1x128xf32>
    %141 = arith.mulf %120, %140 : vector<1x128xf32>
    %142 = arith.mulf %130, %141 : vector<1x128xf32>
    %143 = arith.subf %121, %142 : vector<1x128xf32>
    %144 = vector.broadcast %141 : vector<1x128xf32> to vector<8x128xf32>
    %145 = arith.mulf %126, %144 : vector<8x128xf32>
    %146 = vector.broadcast %143 : vector<1x128xf32> to vector<8x128xf32>
    %147 = arith.addf %145, %146 : vector<8x128xf32>
    %148 = arith.addf %31, %60 : vector<8x128xf32>
    %149 = arith.addf %148, %89 : vector<8x128xf32>
    %150 = arith.addf %149, %118 : vector<8x128xf32>
    %151 = arith.addf %150, %147 : vector<8x128xf32>
    %c5 = arith.constant 5 : index
    %c0_55 = arith.constant 0 : index
    %152 = vector.load %arg4[%c5, %c0_55] : memref<24x128xf32, #tpu.memory_space<vmem>>, vector<1x128xf32>
    %c0_56 = arith.constant 0 : index
    %c0_57 = arith.constant 0 : index
    %153 = vector.load %arg3[%c0_56, %c0_57] : memref<128x128xf32, #tpu.memory_space<vmem>>, vector<128x128xf32>
    %cst_58 = arith.constant dense<0.000000e+00> : vector<8x128xf32>
    %154 = tpu.matmul %151, %153, %cst_58 {dimension_numbers = #tpu.dot_dimension_numbers<[1], [0], [0], [1], [0, 0, 1, 1], [], []>} : vector<8x128xf32>, vector<128x128xf32>, vector<8x128xf32> -> vector<8x128xf32>
    %155 = vector.broadcast %152 : vector<1x128xf32> to vector<8x128xf32>
    %156 = arith.addf %154, %155 : vector<8x128xf32>
    %c16 = arith.constant 16 : index
    %c0_59 = arith.constant 0 : index
    %157 = vector.load %arg4[%c16, %c0_59] : memref<24x128xf32, #tpu.memory_space<vmem>>, vector<1x128xf32>
    %cst_60 = arith.constant 1.000000e+00 : f32
    %158 = vector.broadcast %cst_60 : f32 to vector<1x128xf32>
    %159 = arith.cmpf oeq, %157, %158 : vector<1x128xf32>
    %cst_61 = arith.constant 2.000000e+00 : f32
    %160 = vector.broadcast %cst_61 : f32 to vector<1x128xf32>
    %161 = arith.cmpf oeq, %157, %160 : vector<1x128xf32>
    %162 = math.absf %156 : vector<8x128xf32>
    %163 = vector.shape_cast %159 : vector<1x128xi1> to vector<1x128xi1>
    %164 = vector.broadcast %163 : vector<1x128xi1> to vector<8x128xi1>
    %165 = arith.select %164, %162, %156 : vector<8x128xi1>, vector<8x128xf32>
    %cst_62 = arith.constant -1.000000e+30 : f32
    %166 = vector.shape_cast %161 : vector<1x128xi1> to vector<1x128xi1>
    %167 = vector.broadcast %166 : vector<1x128xi1> to vector<8x128xi1>
    %168 = vector.broadcast %cst_62 : f32 to vector<8x128xf32>
    %169 = arith.select %167, %165, %168 : vector<8x128xi1>, vector<8x128xf32>
    %cst_63 = arith.constant dense<0xFF800000> : vector<8xf32>
    %170 = vector.multi_reduction <maximumf>, %169, %cst_63 [1] : vector<8x128xf32> to vector<8xf32>
    %171 = vector.shape_cast %170 : vector<8xf32> to vector<8x1xf32>
    %172 = vector.broadcast %171 : vector<8x1xf32> to vector<8x128xf32>
    %173 = arith.subf %165, %172 : vector<8x128xf32>
    %cst_64 = arith.constant 0.000000e+00 : f32
    %174 = vector.shape_cast %161 : vector<1x128xi1> to vector<1x128xi1>
    %175 = vector.broadcast %174 : vector<1x128xi1> to vector<8x128xi1>
    %176 = vector.broadcast %cst_64 : f32 to vector<8x128xf32>
    %177 = arith.select %175, %173, %176 : vector<8x128xi1>, vector<8x128xf32>
    %178 = math.exp %177 : vector<8x128xf32>
    %cst_65 = arith.constant 0.000000e+00 : f32
    %179 = vector.shape_cast %161 : vector<1x128xi1> to vector<1x128xi1>
    %180 = vector.broadcast %179 : vector<1x128xi1> to vector<8x128xi1>
    %181 = vector.broadcast %cst_65 : f32 to vector<8x128xf32>
    %182 = arith.select %180, %178, %181 : vector<8x128xi1>, vector<8x128xf32>
    %cst_66 = arith.constant dense<0.000000e+00> : vector<8xf32>
    %183 = vector.multi_reduction <add>, %182, %cst_66 [1] : vector<8x128xf32> to vector<8xf32>
    %184 = vector.shape_cast %183 : vector<8xf32> to vector<8x1xf32>
    %cst_67 = arith.constant 1.000000e+00 : f32
    %185 = vector.broadcast %cst_67 : f32 to vector<8x1xf32>
    %186 = arith.divf %185, %184 : vector<8x1xf32>
    %187 = vector.broadcast %186 : vector<8x1xf32> to vector<8x128xf32>
    %188 = arith.mulf %182, %187 : vector<8x128xf32>
    %189 = vector.shape_cast %161 : vector<1x128xi1> to vector<1x128xi1>
    %190 = vector.broadcast %189 : vector<1x128xi1> to vector<8x128xi1>
    %191 = arith.select %190, %188, %165 : vector<8x128xi1>, vector<8x128xf32>
    %c0_68 = arith.constant 0 : index
    %c0_69 = arith.constant 0 : index
    %192 = vector.load %arg5[%c0_68, %c0_69] : memref<8x128xf32, #tpu.memory_space<vmem>>, vector<8x128xf32>
    tpu.vector_store %arg5[%c0_68, %c0_69], %191 {strides = array<i32>} : memref<8x128xf32, #tpu.memory_space<vmem>>, vector<8x128xf32>,
    return
  }
}

</mosaic_0001>

<bundles_post_ra>
// kernel: mg2_forward.1
= control target key start
LH: loop header
LB: loop body
LE: loop exit
PB: predicated region body
PF: predicated region fallthrough
CT: control target
= control target key end

     0   :  { %10 = vsyncpa [#allocation3], 0  ;;  %s1521_s0 = inlined_call_operand.vmem [shape: f32[8,128], index: 0, kind: input, shape index: {}]   ;;  %s1522_s1 = inlined_call_operand.hbm [shape: f32[128,128], index: 1, kind: input, shape index: {}]   ;;  %s1523_s2 = inlined_call_operand.hbm [shape: f32[128,128], index: 2, kind: input, shape index: {}]   ;;  %s1524_s3 = inlined_call_operand.hbm [shape: f32[128,128], index: 3, kind: input, shape index: {}]   ;;  %s1525_s4 = inlined_call_operand.vmem [shape: f32[24,128], index: 4, kind: input, shape index: {}]   ;;  %s1526_s5 = inlined_call_operand.vmem [shape: f32[8,128], index: 5, kind: output, shape index: {}]  }
   0x1   :  { %11 = vsyncpa [#allocation5], 0  ;;  %s1176_s18 = smov [#allocation4]   ;;  %s1177_s20 = smov [#allocation2]  }
   0x2   :  { %s31_s19 = sshll.u32 %s1176_s18, 4  ;;  %s19_s21 = sshll.u32 %s1177_s20, 4  ;;  %s32_s19 = int_to_ptr.vmem [resolvable:$true] %s31_s19  ;;  %s20_s21 = int_to_ptr.vmem [resolvable:$true] %s19_s21 }
   0x3   :  { %s1120_s22 = scalar_lea.vmem %s32_s19, 2048  ;;  %p1125_p1 = scmp.lt.s32.totalorder %s32_s19, %s32_s19 }
   0x4   :  { %p1121_p0 = scmp.ne.s32.totalorder %s32_s19, %s1120_s22  ;;  %p1126_p2 = scmp.lt.s32.totalorder %s1120_s22, %s1120_s22 }
   0x6   :  { %p1127_p3 = por %p1126_p2, %p1125_p1 }
   0x8   :  { %p1128_p4 = pnand %p1127_p3, %p1121_p0 }
   0xa   :  { %1131 = shalt.err (!%p1128_p4)
}
   0xb   :  { %s1178_s23 = smov 128   ;;  %s1179_s24 = smov 8  }
   0xc   :  { %37 = dma.hbm_to_vmem [thread:$0]  %s1523_s2, 2048, %s32_s19, [#allocation5], %s1178_s23, %s1178_s23, %s1179_s24  }
   0xd   :  { %s1140_s27 = scalar_lea.vmem %s20_s21, 2048  ;;  %p1145_p6 = scmp.lt.s32.totalorder %s20_s21, %s20_s21 }
   0xe   :  { %p1141_p5 = scmp.ne.s32.totalorder %s20_s21, %s1140_s27  ;;  %p1146_p7 = scmp.lt.s32.totalorder %s1140_s27, %s1140_s27 }
  0x10   :  { %p1147_p8 = por %p1146_p7, %p1145_p6 }
  0x12   :  { %p1148_p9 = pnand %p1147_p8, %p1141_p5 }
  0x14   :  { %1151 = shalt.err (!%p1148_p9)
}
  0x15   :  { %25 = dma.hbm_to_vmem [thread:$0]  %s1522_s1, 2048, %s20_s21, [#allocation3], %s1178_s23, %s1178_s23, %s1179_s24  }
  0x16   :  { %s1180_s30 = smov [#allocation6]  }
  0x17   :  { %s43_s6 = sshll.u32 %s1180_s30, 4  ;;  %s44_s6 = int_to_ptr.vmem [resolvable:$true] %s43_s6 }
  0x18   :  { %s1160_s7 = scalar_lea.vmem %s44_s6, 2048  ;;  %p1165_p11 = scmp.lt.s32.totalorder %s44_s6, %s44_s6 }
  0x19   :  { %p1161_p10 = scmp.ne.s32.totalorder %s44_s6, %s1160_s7  ;;  %p1166_p12 = scmp.lt.s32.totalorder %s1160_s7, %s1160_s7 }
  0x1b   :  { %p1167_p13 = por %p1166_p12, %p1165_p11 }
  0x1d   :  { %p1168_p0 = pnand %p1167_p13, %p1161_p10 }
  0x1f   :  { %1171 = shalt.err (!%p1168_p0)
}
  0x20   :  { %49 = dma.hbm_to_vmem [thread:$0]  %s1524_s3, 2048, %s44_s6, [#allocation5], %s1178_s23, %s1178_s23, %s1179_s24  }
  0x21   :  { %1172 = dma.done.wait [#allocation3], 2048  }
  0x22   :  { %1173 = vsyncadd [#allocation3], 4294965248 }
  0x23   :  { %1174 = dma.done.wait [#allocation5], 4096  }
  0x24   :  { %1175 = vsyncadd [#allocation5], 4294963200  ;;  %v1181_v0 = vmov 0.0   ;;  %vm1182_vm0 = vmmov 0   ;;  %v93_v1 = vld [vmem:[#allocation2 + $0x78] sm:$0xff]  ;;  %v92_v2 = vld [vmem:[#allocation2 + $0x70] sm:$0xff]  ;;  %v193_v56 = vlaneseq }
  0x25   :  { %880 = vmatprep.subr.mxu0 %v1181_v0  ;;  %912 = vmatprep.mubr.msk.f32.mxu0 %vm1182_vm0, %v1181_v0  ;;  %v91_v3 = vld [vmem:[#allocation2 + $0x68] sm:$0xff]  ;;  %v90_v4 = vld [vmem:[#allocation2 + $0x60] sm:$0xff]  ;;  %v89_v5 = vld [vmem:[#allocation2 + $0x58] sm:$0xff] }
  0x26   :  { %915 = vmatprep.subr.mxu1 %v1181_v0  ;;  %947 = vmatprep.mubr.msk.f32.mxu1 %vm1182_vm0, %v1181_v0  ;;  %v88_v6 = vld [vmem:[#allocation2 + $0x50] sm:$0xff]  ;;  %v87_v7 = vld [vmem:[#allocation2 + $0x48] sm:$0xff]  ;;  %v86_v8 = vld [vmem:[#allocation2 + $0x40] sm:$0xff]  ;;  %v194_v57 = vshrl.u32 %v193_v56, 7 }
  0x27   :  { %881 = vmatpush3.msra.mxu0 %v93_v1  ;;  %v85_v9 = vld [vmem:[#allocation2 + $0x38] sm:$0xff]  ;;  %v84_v10 = vld [vmem:[#allocation2 + $0x30] sm:$0xff]  ;;  %v83_v11 = vld [vmem:[#allocation2 + $0x28] sm:$0xff] }
  0x28   :  { %882 = vmatprep.subr.mxu0 %v1181_v0  ;;  %v82_v12 = vld [vmem:[#allocation2 + $0x20] sm:$0xff]  ;;  %v81_v13 = vld [vmem:[#allocation2 + $0x18] sm:$0xff]  ;;  %v80_v14 = vld [vmem:[#allocation2 + $0x10] sm:$0xff]  ;;  %v1352_v59 = vsub.s32 0, %v194_v57 }
  0x29   :  { %883 = vmatpush3.msra.mxu0 %v92_v2  ;;  %v79_v15 = vld [vmem:[#allocation2 + $0x8] sm:$0xff]  ;;  %v78_v16 = vld [vmem:[#allocation2] sm:$0xff]  ;;  %v1250_v18 = vld [vmem:[#allocation4 + $0x78] sm:$0xff] }
  0x2a   :  { %884 = vmatprep.subr.mxu0 %v1181_v0  ;;  %v77_v17 = vld [vmem:[%s1521_s0] sm:$0xff]  ;;  %916 = vmatpush3.msra.mxu1 %v1250_v18  ;;  %v1255_v19 = vld [vmem:[#allocation4 + $0x70] sm:$0xff]  ;;  %v1261_v20 = vld [vmem:[#allocation4 + $0x68] sm:$0xff] }
  0x2b   :  { %885 = vmatpush3.msra.mxu0 %v91_v3  ;;  %917 = vmatprep.subr.mxu1 %v1181_v0  ;;  %v1267_v21 = vld [vmem:[#allocation4 + $0x60] sm:$0xff]  ;;  %v1273_v22 = vld [vmem:[#allocation4 + $0x58] sm:$0xff]  ;;  %v1275_v23 = vld [vmem:[#allocation4 + $0x50] sm:$0xff] }
  0x2c   :  { %886 = vmatprep.subr.mxu0 %v1181_v0  ;;  %918 = vmatpush3.msra.mxu1 %v1255_v19  ;;  %v1281_v24 = vld [vmem:[#allocation4 + $0x48] sm:$0xff]  ;;  %v1287_v25 = vld [vmem:[#allocation4 + $0x40] sm:$0xff]  ;;  %v1293_v26 = vld [vmem:[#allocation4 + $0x38] sm:$0xff] }
  0x2d   :  { %887 = vmatpush3.msra.mxu0 %v90_v4  ;;  %919 = vmatprep.subr.mxu1 %v1181_v0  ;;  %v1299_v27 = vld [vmem:[#allocation4 + $0x30] sm:$0xff]  ;;  %v1305_v28 = vld [vmem:[#allocation4 + $0x28] sm:$0xff]  ;;  %v1311_v29 = vld [vmem:[#allocation4 + $0x20] sm:$0xff] }
  0x2e   :  { %888 = vmatprep.subr.mxu0 %v1181_v0  ;;  %920 = vmatpush3.msra.mxu1 %v1261_v20  ;;  %v1317_v30 = vld [vmem:[#allocation4 + $0x18] sm:$0xff]  ;;  %v1323_v31 = vld [vmem:[#allocation4 + $0x10] sm:$0xff]  ;;  %v1329_v32 = vld [vmem:[#allocation4 + $0x8] sm:$0xff] }
  0x2f   :  { %889 = vmatpush3.msra.mxu0 %v89_v5  ;;  %921 = vmatprep.subr.mxu1 %v1181_v0  ;;  %v1335_v33 = vld [vmem:[#allocation4] sm:$0xff]  ;;  %v96_v62 = vld [vmem:[%s1525_s4 + $0xb] sm:$0x1] }
  0x30   :  { %890 = vmatprep.subr.mxu0 %v1181_v0  ;;  %922 = vmatpush3.msra.mxu1 %v1267_v21  ;;  %v772_v34 = vld [vmem:[%s1525_s4] ss:$0 sm:$0xff]  ;;  %v95_v58 = vld [vmem:[%s1525_s4 + $0x6] sm:$0x1] }
  0x31   :  { %891 = vmatpush3.msra.mxu0 %v88_v6  ;;  %923 = vmatprep.subr.mxu1 %v1181_v0  ;;  %v773_v6 = vld [vmem:[%s1525_s4 + $0x1] ss:$0 sm:$0xff] }
  0x32   :  { %892 = vmatprep.subr.mxu0 %v1181_v0  ;;  %924 = vmatpush3.msra.mxu1 %v1273_v22 }
  0x33   :  { %893 = vmatpush3.msra.mxu0 %v87_v7  ;;  %925 = vmatprep.subr.mxu1 %v1181_v0 }
  0x34   :  { %894 = vmatprep.subr.mxu0 %v1181_v0  ;;  %926 = vmatpush3.msra.mxu1 %v1275_v23 }
  0x35   :  { %895 = vmatpush3.msra.mxu0 %v86_v8  ;;  %927 = vmatprep.subr.mxu1 %v1181_v0 }
  0x36   :  { %896 = vmatprep.subr.mxu0 %v1181_v0  ;;  %928 = vmatpush3.msra.mxu1 %v1281_v24 }
  0x37   :  { %897 = vmatpush3.msra.mxu0 %v85_v9  ;;  %929 = vmatprep.subr.mxu1 %v1181_v0 }
  0x38   :  { %898 = vmatprep.subr.mxu0 %v1181_v0  ;;  %930 = vmatpush3.msra.mxu1 %v1287_v25 }
  0x39   :  { %899 = vmatpush3.msra.mxu0 %v84_v10  ;;  %931 = vmatprep.subr.mxu1 %v1181_v0 }
  0x3a   :  { %900 = vmatprep.subr.mxu0 %v1181_v0  ;;  %932 = vmatpush3.msra.mxu1 %v1293_v26 }
  0x3b   :  { %901 = vmatpush3.msra.mxu0 %v83_v11  ;;  %933 = vmatprep.subr.mxu1 %v1181_v0 }
  0x3c   :  { %902 = vmatprep.subr.mxu0 %v1181_v0  ;;  %934 = vmatpush3.msra.mxu1 %v1299_v27 }
  0x3d   :  { %903 = vmatpush3.msra.mxu0 %v82_v12  ;;  %935 = vmatprep.subr.mxu1 %v1181_v0 }
  0x3e   :  { %904 = vmatprep.subr.mxu0 %v1181_v0  ;;  %936 = vmatpush3.msra.mxu1 %v1305_v28 }
  0x3f   :  { %905 = vmatpush3.msra.mxu0 %v81_v13  ;;  %937 = vmatprep.subr.mxu1 %v1181_v0 }
  0x40   :  { %906 = vmatprep.subr.mxu0 %v1181_v0  ;;  %938 = vmatpush3.msra.mxu1 %v1311_v29 }
  0x41   :  { %907 = vmatpush3.msra.mxu0 %v80_v14  ;;  %939 = vmatprep.subr.mxu1 %v1181_v0 }
  0x42   :  { %908 = vmatprep.subr.mxu0 %v1181_v0  ;;  %940 = vmatpush3.msra.mxu1 %v1317_v30 }
  0x43   :  { %909 = vmatpush3.msra.mxu0 %v79_v15  ;;  %941 = vmatprep.subr.mxu1 %v1181_v0 }
  0x44   :  { %910 = vmatprep.subr.mxu0 %v1181_v0  ;;  %942 = vmatpush3.msra.mxu1 %v1323_v31 }
  0x45   :  { %911 = vmatpush3.msra.mxu0 %v78_v16  ;;  %943 = vmatprep.subr.mxu1 %v1181_v0 }
  0x46   :  { %913 = vmatmul.mubr.f32.vlgmr.msra.gmra.mxu0 %v77_v17  ;;  %950 = vmatprep.subr.mxu0 %v1181_v0 }
  0x47   :  { %982 = vmatprep.mubr.msk.f32.mxu0 %vm1182_vm0, %v1181_v0  ;;  %951 = vmatpush3.msra.mxu0 %v1250_v18 }
  0x48   :  { %952 = vmatprep.subr.mxu0 %v1181_v0  ;;  %944 = vmatpush3.msra.mxu1 %v1329_v32 }
  0x49   :  { %953 = vmatpush3.msra.mxu0 %v1255_v19  ;;  %945 = vmatprep.subr.mxu1 %v1181_v0 }
  0x4a   :  { %954 = vmatprep.subr.mxu0 %v1181_v0  ;;  %946 = vmatpush3.msra.mxu1 %v1335_v33 }
  0x4b   :  { %955 = vmatpush3.msra.mxu0 %v1261_v20  ;;  %985 = vmatprep.subr.mxu1 %v1181_v0 }
  0x4c   :  { %956 = vmatprep.subr.mxu0 %v1181_v0 }
  0x4d   :  { %957 = vmatpush3.msra.mxu0 %v1267_v21 }
  0x4e   :  { %958 = vmatprep.subr.mxu0 %v1181_v0 }
  0x4f   :  { %959 = vmatpush3.msra.mxu0 %v1273_v22 }
  0x50   :  { %960 = vmatprep.subr.mxu0 %v1181_v0 }
  0x51   :  { %961 = vmatpush3.msra.mxu0 %v1275_v23 }
  0x52   :  { %962 = vmatprep.subr.mxu0 %v1181_v0 }
  0x53   :  { %963 = vmatpush3.msra.mxu0 %v1281_v24 }
  0x54   :  { %964 = vmatprep.subr.mxu0 %v1181_v0 }
  0x55   :  { %965 = vmatpush3.msra.mxu0 %v1287_v25 }
  0x56   :  { %966 = vmatprep.subr.mxu0 %v1181_v0 }
  0x57   :  { %967 = vmatpush3.msra.mxu0 %v1293_v26 }
  0x58   :  { %968 = vmatprep.subr.mxu0 %v1181_v0 }
  0x59   :  { %969 = vmatpush3.msra.mxu0 %v1299_v27 }
  0x5a   :  { %970 = vmatprep.subr.mxu0 %v1181_v0 }
  0x5b   :  { %971 = vmatpush3.msra.mxu0 %v1305_v28 }
  0x5c   :  { %972 = vmatprep.subr.mxu0 %v1181_v0 }
  0x5d   :  { %973 = vmatpush3.msra.mxu0 %v1311_v29 }
  0x5e   :  { %974 = vmatprep.subr.mxu0 %v1181_v0 }
  0x5f   :  { %975 = vmatpush3.msra.mxu0 %v1317_v30 }
  0x60   :  { %976 = vmatprep.subr.mxu0 %v1181_v0 }
  0x61   :  { %977 = vmatpush3.msra.mxu0 %v1323_v31 }
  0x62   :  { %978 = vmatprep.subr.mxu0 %v1181_v0 }
  0x63   :  { %979 = vmatpush3.msra.mxu0 %v1329_v32 }
  0x64   :  { %980 = vmatprep.subr.mxu0 %v1181_v0 }
  0x65   :  { %981 = vmatpush3.msra.mxu0 %v1335_v33 }
  0x66   :  { %1020 = vmatprep.subr.mxu0 %v1181_v0 }
 0x106   :  { %v167_v35 = vpop.f32.mrf.mxu0 }
 0x107   :  { %v168_v36 = vadd.f32 %v772_v34, %v167_v35 }
 0x108   :  { %v914_v37 = vpop.f32.mrf.mxu0 }
 0x109   :  { %v171_v38 = vmax.f32 %v168_v36, 0.0 }
 0x10b   :  { %v172_v39 = vrot.slane %v171_v38, 4 }
 0x10d   :  { %v173_v40 = vadd.f32 %v172_v39, %v171_v38 }
 0x10f   :  { %v174_v41 = vrot.slane %v173_v40, 2 }
 0x111   :  { %v175_v42 = vadd.f32 %v174_v41, %v173_v40 }
 0x113   :  { %v176_v43 = vrot.slane %v175_v42, 1 }
 0x115   :  { %v177_v44 = vadd.f32 %v176_v43, %v175_v42 }
 0x117   :  { %v178_v45 = vmul.f32 0.125, %v177_v44  ;;  %v204_v44 = vld [vmem:[%s1525_s4 + $0x7] sm:$0x1] }
 0x119   :  { %v179_v46 = vsub.f32 %v171_v38, %v178_v45 }
 0x11b   :  { %v180_v47 = vmul.f32 %v179_v46, %v179_v46 }
 0x11d   :  { %v181_v48 = vrot.slane %v180_v47, 4 }
 0x11f   :  { %v182_v49 = vadd.f32 %v181_v48, %v180_v47  ;;  %v205_v47 = vld [vmem:[%s1525_s4 + $0xc] sm:$0x1] }
 0x121   :  { %v183_v50 = vrot.slane %v182_v49, 2 }
 0x123   :  { %v184_v51 = vadd.f32 %v183_v50, %v182_v49 }
 0x125   :  { %v185_v52 = vrot.slane %v184_v51, 1 }
 0x127   :  { %v186_v53 = vadd.f32 %v185_v52, %v184_v51 }
 0x129   :  { %v187_v54 = vmul.f32 0.125, %v186_v53 }
 0x12b   :  { %v188_v55 = vadd.f32 1e-05, %v187_v54 }
 0x12d   :  { %1098 = vrsqrt.f32 %v188_v55 }
 0x13a   :  { %v1099_v60 = vpop.eup %1098 }
 0x13b   :  { %v190_v61 = vmul.f32 %v1099_v60, %v95_v58 }
 0x13d   :  { %v191_v63 = vmul.f32 %v190_v61, %v178_v45  ;;  %v196_v1 = vrot.slane %v190_v61, %v1352_v59  ;;  %v313_v61 = vld [vmem:[%s1525_s4 + $0x8] sm:$0x1] }
 0x13f   :  { %v192_v2 = vsub.f32 %v96_v62, %v191_v63  ;;  %v197_v3 = vmul.f32 %v196_v1, %v171_v38  ;;  %v314_v1 = vld [vmem:[%s1525_s4 + $0xd] sm:$0x1] }
 0x141   :  { %v201_v4 = vrot.slane %v192_v2, %v1352_v59 }
 0x143   :  { %v1359_v5 = vadd.f32 %v201_v4, %v197_v3 }
 0x145   :  { %948 = vmatmul.mubr.f32.vlgmr.msra.gmra.mxu1 %v1359_v5 }
 0x146   :  { %986 = vmatpush3.msra.mxu1 %v1250_v18  ;;  %1017 = vmatprep.mubr.msk.f32.mxu1 %vm1182_vm0, %v1181_v0 }
 0x147   :  { %987 = vmatprep.subr.mxu1 %v1181_v0 }
 0x148   :  { %988 = vmatpush3.msra.mxu1 %v1255_v19 }
 0x149   :  { %989 = vmatprep.subr.mxu1 %v1181_v0 }
 0x14a   :  { %990 = vmatpush3.msra.mxu1 %v1261_v20 }
 0x14b   :  { %991 = vmatprep.subr.mxu1 %v1181_v0 }
 0x14c   :  { %992 = vmatpush3.msra.mxu1 %v1267_v21 }
 0x14d   :  { %993 = vmatprep.subr.mxu1 %v1181_v0 }
 0x14e   :  { %994 = vmatpush3.msra.mxu1 %v1273_v22 }
 0x14f   :  { %995 = vmatprep.subr.mxu1 %v1181_v0 }
 0x150   :  { %996 = vmatpush3.msra.mxu1 %v1275_v23 }
 0x151   :  { %997 = vmatprep.subr.mxu1 %v1181_v0 }
 0x152   :  { %998 = vmatpush3.msra.mxu1 %v1281_v24 }
 0x153   :  { %999 = vmatprep.subr.mxu1 %v1181_v0 }
 0x154   :  { %1000 = vmatpush3.msra.mxu1 %v1287_v25 }
 0x155   :  { %1001 = vmatprep.subr.mxu1 %v1181_v0 }
 0x156   :  { %1002 = vmatpush3.msra.mxu1 %v1293_v26 }
 0x157   :  { %1003 = vmatprep.subr.mxu1 %v1181_v0 }
 0x158   :  { %1004 = vmatpush3.msra.mxu1 %v1299_v27 }
 0x159   :  { %1005 = vmatprep.subr.mxu1 %v1181_v0 }
 0x15a   :  { %1006 = vmatpush3.msra.mxu1 %v1305_v28 }
 0x15b   :  { %1007 = vmatprep.subr.mxu1 %v1181_v0 }
 0x15c   :  { %1008 = vmatpush3.msra.mxu1 %v1311_v29 }
 0x15d   :  { %1009 = vmatprep.subr.mxu1 %v1181_v0 }
 0x15e   :  { %1010 = vmatpush3.msra.mxu1 %v1317_v30 }
 0x15f   :  { %1011 = vmatprep.subr.mxu1 %v1181_v0 }
 0x160   :  { %1012 = vmatpush3.msra.mxu1 %v1323_v31 }
 0x161   :  { %1013 = vmatprep.subr.mxu1 %v1181_v0 }
 0x162   :  { %1014 = vmatpush3.msra.mxu1 %v1329_v32 }
 0x163   :  { %1015 = vmatprep.subr.mxu1 %v1181_v0 }
 0x164   :  { %1016 = vmatpush3.msra.mxu1 %v1335_v33 }
 0x165   :  { %1055 = vmatprep.subr.mxu1 %v1181_v0 }
 0x205   :  { %v276_v7 = vpop.f32.mrf.mxu1 }
 0x206   :  { %v277_v8 = vadd.f32 %v773_v6, %v276_v7 }
 0x207   :  { %v949_v9 = vpop.f32.mrf.mxu1 }
 0x208   :  { %v280_v10 = vmax.f32 %v277_v8, 0.0 }
 0x20a   :  { %v281_v11 = vrot.slane %v280_v10, 4 }
 0x20c   :  { %v282_v12 = vadd.f32 %v281_v11, %v280_v10  ;;  %v775_v11 = vld [vmem:[%s1525_s4 + $0x3] ss:$0 sm:$0xff] }
 0x20e   :  { %v283_v13 = vrot.slane %v282_v12, 2 }
 0x210   :  { %v284_v14 = vadd.f32 %v283_v13, %v282_v12 }
 0x212   :  { %v285_v15 = vrot.slane %v284_v14, 1 }
 0x214   :  { %v286_v16 = vadd.f32 %v285_v15, %v284_v14 }
 0x216   :  { %v287_v17 = vmul.f32 0.125, %v286_v16 }
 0x218   :  { %v288_v34 = vsub.f32 %v280_v10, %v287_v17 }
 0x21a   :  { %v289_v35 = vmul.f32 %v288_v34, %v288_v34 }
 0x21c   :  { %v290_v36 = vrot.slane %v289_v35, 4 }
 0x21e   :  { %v291_v37 = vadd.f32 %v290_v36, %v289_v35 }
 0x220   :  { %v292_v38 = vrot.slane %v291_v37, 2 }
 0x222   :  { %v293_v39 = vadd.f32 %v292_v38, %v291_v37 }
 0x224   :  { %v294_v40 = vrot.slane %v293_v39, 1 }
 0x226   :  { %v295_v41 = vadd.f32 %v294_v40, %v293_v39 }
 0x228   :  { %v296_v42 = vmul.f32 0.125, %v295_v41 }
 0x22a   :  { %v297_v43 = vadd.f32 1e-05, %v296_v42 }
 0x22c   :  { %1100 = vrsqrt.f32 %v297_v43 }
 0x239   :  { %v1101_v45 = vpop.eup %1100 }
 0x23a   :  { %v299_v46 = vmul.f32 %v1101_v45, %v204_v44 }
 0x23c   :  { %v300_v48 = vmul.f32 %v299_v46, %v287_v17  ;;  %v305_v49 = vrot.slane %v299_v46, %v1352_v59 }
 0x23e   :  { %v301_v50 = vsub.f32 %v205_v47, %v300_v48  ;;  %v306_v51 = vmul.f32 %v305_v49, %v280_v10  ;;  %v422_v48 = vld [vmem:[%s1525_s4 + $0x9] sm:$0x1] }
 0x240   :  { %v310_v52 = vrot.slane %v301_v50, %v1352_v59 }
 0x242   :  { %v1407_v53 = vadd.f32 %v310_v52, %v306_v51  ;;  %v423_v51 = vld [vmem:[%s1525_s4 + $0xe] sm:$0x1] }
 0x244   :  { %983 = vmatmul.mubr.f32.vlgmr.msra.gmra.mxu0 %v1407_v53  ;;  %v639_v8 = vadd.f32 %v1407_v53, %v1359_v5 }
 0x245   :  { %1021 = vmatpush3.msra.mxu0 %v1250_v18  ;;  %1052 = vmatprep.mubr.msk.f32.mxu0 %vm1182_vm0, %v1181_v0  ;;  %v774_v18 = vld [vmem:[%s1525_s4 + $0x2] ss:$0 sm:$0xff] }
 0x246   :  { %1022 = vmatprep.subr.mxu0 %v1181_v0 }
 0x247   :  { %1023 = vmatpush3.msra.mxu0 %v1255_v19 }
 0x248   :  { %1024 = vmatprep.subr.mxu0 %v1181_v0 }
 0x249   :  { %1025 = vmatpush3.msra.mxu0 %v1261_v20 }
 0x24a   :  { %1026 = vmatprep.subr.mxu0 %v1181_v0 }
 0x24b   :  { %1027 = vmatpush3.msra.mxu0 %v1267_v21 }
 0x24c   :  { %1028 = vmatprep.subr.mxu0 %v1181_v0 }
 0x24d   :  { %1029 = vmatpush3.msra.mxu0 %v1273_v22 }
 0x24e   :  { %1030 = vmatprep.subr.mxu0 %v1181_v0 }
 0x24f   :  { %1031 = vmatpush3.msra.mxu0 %v1275_v23 }
 0x250   :  { %1032 = vmatprep.subr.mxu0 %v1181_v0 }
 0x251   :  { %1033 = vmatpush3.msra.mxu0 %v1281_v24 }
 0x252   :  { %1034 = vmatprep.subr.mxu0 %v1181_v0 }
 0x253   :  { %1035 = vmatpush3.msra.mxu0 %v1287_v25 }
 0x254   :  { %1036 = vmatprep.subr.mxu0 %v1181_v0 }
 0x255   :  { %1037 = vmatpush3.msra.mxu0 %v1293_v26 }
 0x256   :  { %1038 = vmatprep.subr.mxu0 %v1181_v0 }
 0x257   :  { %1039 = vmatpush3.msra.mxu0 %v1299_v27 }
 0x258   :  { %1040 = vmatprep.subr.mxu0 %v1181_v0 }
 0x259   :  { %1041 = vmatpush3.msra.mxu0 %v1305_v28 }
 0x25a   :  { %1042 = vmatprep.subr.mxu0 %v1181_v0 }
 0x25b   :  { %1043 = vmatpush3.msra.mxu0 %v1311_v29 }
 0x25c   :  { %1044 = vmatprep.subr.mxu0 %v1181_v0 }
 0x25d   :  { %1045 = vmatpush3.msra.mxu0 %v1317_v30 }
 0x25e   :  { %1046 = vmatprep.subr.mxu0 %v1181_v0 }
 0x25f   :  { %1047 = vmatpush3.msra.mxu0 %v1323_v31 }
 0x260   :  { %1048 = vmatprep.subr.mxu0 %v1181_v0 }
 0x261   :  { %1049 = vmatpush3.msra.mxu0 %v1329_v32 }
 0x262   :  { %1050 = vmatprep.subr.mxu0 %v1181_v0 }
 0x263   :  { %1051 = vmatpush3.msra.mxu0 %v1335_v33 }
 0x304   :  { %v385_v19 = vpop.f32.mrf.mxu0 }
 0x305   :  { %v386_v20 = vadd.f32 %v774_v18, %v385_v19 }
 0x306   :  { %v984_v21 = vpop.f32.mrf.mxu0 }
 0x307   :  { %v389_v22 = vmax.f32 %v386_v20, 0.0 }
 0x309   :  { %v390_v23 = vrot.slane %v389_v22, 4 }
 0x30b   :  { %v391_v24 = vadd.f32 %v390_v23, %v389_v22  ;;  %v659_v23 = vld [vmem:[#allocation6 + $0x78] sm:$0xff] }
 0x30d   :  { %v392_v25 = vrot.slane %v391_v24, 2 }
 0x30f   :  { %v393_v26 = vadd.f32 %v392_v25, %v391_v24  ;;  %v658_v24 = vld [vmem:[#allocation6 + $0x70] sm:$0xff]  ;;  %v657_v25 = vld [vmem:[#allocation6 + $0x68] sm:$0xff] }
 0x311   :  { %v394_v27 = vrot.slane %v393_v26, 1 }
 0x313   :  { %v395_v28 = vadd.f32 %v394_v27, %v393_v26  ;;  %v656_v26 = vld [vmem:[#allocation6 + $0x60] sm:$0xff]  ;;  %v655_v27 = vld [vmem:[#allocation6 + $0x58] sm:$0xff] }
 0x315   :  { %v396_v29 = vmul.f32 0.125, %v395_v28  ;;  %v654_v28 = vld [vmem:[#allocation6 + $0x50] sm:$0xff] }
 0x317   :  { %v397_v30 = vsub.f32 %v389_v22, %v396_v29 }
 0x319   :  { %v398_v31 = vmul.f32 %v397_v30, %v397_v30  ;;  %v652_v30 = vld [vmem:[#allocation6 + $0x40] sm:$0xff] }
 0x31b   :  { %v399_v32 = vrot.slane %v398_v31, 4 }
 0x31d   :  { %v400_v54 = vadd.f32 %v399_v32, %v398_v31  ;;  %v651_v31 = vld [vmem:[#allocation6 + $0x38] sm:$0xff]  ;;  %v650_v32 = vld [vmem:[#allocation6 + $0x30] sm:$0xff] }
 0x31f   :  { %v401_v33 = vrot.slane %v400_v54, 2 }
 0x321   :  { %v402_v55 = vadd.f32 %v401_v33, %v400_v54  ;;  %v649_v54 = vld [vmem:[#allocation6 + $0x28] sm:$0xff]  ;;  %v648_v33 = vld [vmem:[#allocation6 + $0x20] sm:$0xff] }
 0x323   :  { %v403_v56 = vrot.slane %v402_v55, 1 }
 0x325   :  { %v404_v57 = vadd.f32 %v403_v56, %v402_v55  ;;  %v647_v55 = vld [vmem:[#allocation6 + $0x18] sm:$0xff]  ;;  %v646_v56 = vld [vmem:[#allocation6 + $0x10] sm:$0xff] }
 0x327   :  { %v405_v58 = vmul.f32 0.125, %v404_v57  ;;  %v645_v57 = vld [vmem:[#allocation6 + $0x8] sm:$0xff] }
 0x329   :  { %v406_v60 = vadd.f32 1e-05, %v405_v58  ;;  %v644_v58 = vld [vmem:[#allocation6] sm:$0xff] }
 0x32b   :  { %1102 = vrsqrt.f32 %v406_v60  ;;  %v776_v60 = vld [vmem:[%s1525_s4 + $0x4] ss:$0 sm:$0xff] }
 0x338   :  { %v1103_v62 = vpop.eup %1102 }
 0x339   :  { %v408_v63 = vmul.f32 %v1103_v62, %v313_v61 }
 0x33b   :  { %v409_v2 = vmul.f32 %v408_v63, %v396_v29  ;;  %v414_v3 = vrot.slane %v408_v63, %v1352_v59  ;;  %v653_v29 = vld [vmem:[#allocation6 + $0x48] sm:$0xff] }
 0x33d   :  { %v410_v4 = vsub.f32 %v314_v1, %v409_v2  ;;  %v415_v6 = vmul.f32 %v414_v3, %v389_v22 }
 0x33f   :  { %v419_v7 = vrot.slane %v410_v4, %v1352_v59 }
 0x341   :  { %v420_v9 = vadd.f32 %v419_v7, %v415_v6 }
 0x343   :  { %1018 = vmatmul.mubr.f32.vlgmr.msra.gmra.mxu1 %v420_v9  ;;  %v640_v10 = vadd.f32 %v639_v8, %v420_v9 }
 0x344   :  { %1087 = vmatprep.mubr.msk.f32.mxu1 %vm1182_vm0, %v1181_v0  ;;  %1056 = vmatpush3.msra.mxu1 %v659_v23 }
 0x345   :  { %1057 = vmatprep.subr.mxu1 %v1181_v0 }
 0x346   :  { %1058 = vmatpush3.msra.mxu1 %v658_v24 }
 0x347   :  { %1059 = vmatprep.subr.mxu1 %v1181_v0 }
 0x348   :  { %1060 = vmatpush3.msra.mxu1 %v657_v25 }
 0x349   :  { %1061 = vmatprep.subr.mxu1 %v1181_v0 }
 0x34a   :  { %1062 = vmatpush3.msra.mxu1 %v656_v26 }
 0x34b   :  { %1063 = vmatprep.subr.mxu1 %v1181_v0 }
 0x34c   :  { %1064 = vmatpush3.msra.mxu1 %v655_v27 }
 0x34d   :  { %1065 = vmatprep.subr.mxu1 %v1181_v0 }
 0x34e   :  { %1066 = vmatpush3.msra.mxu1 %v654_v28 }
 0x34f   :  { %1067 = vmatprep.subr.mxu1 %v1181_v0 }
 0x350   :  { %1068 = vmatpush3.msra.mxu1 %v653_v29 }
 0x351   :  { %1069 = vmatprep.subr.mxu1 %v1181_v0 }
 0x352   :  { %1070 = vmatpush3.msra.mxu1 %v652_v30 }
 0x353   :  { %1071 = vmatprep.subr.mxu1 %v1181_v0 }
 0x354   :  { %1072 = vmatpush3.msra.mxu1 %v651_v31 }
 0x355   :  { %1073 = vmatprep.subr.mxu1 %v1181_v0 }
 0x356   :  { %1074 = vmatpush3.msra.mxu1 %v650_v32 }
 0x357   :  { %1075 = vmatprep.subr.mxu1 %v1181_v0 }
 0x358   :  { %1076 = vmatpush3.msra.mxu1 %v649_v54 }
 0x359   :  { %1077 = vmatprep.subr.mxu1 %v1181_v0 }
 0x35a   :  { %1078 = vmatpush3.msra.mxu1 %v648_v33 }
 0x35b   :  { %1079 = vmatprep.subr.mxu1 %v1181_v0 }
 0x35c   :  { %1080 = vmatpush3.msra.mxu1 %v647_v55 }
 0x35d   :  { %1081 = vmatprep.subr.mxu1 %v1181_v0 }
 0x35e   :  { %1082 = vmatpush3.msra.mxu1 %v646_v56 }
 0x35f   :  { %1083 = vmatprep.subr.mxu1 %v1181_v0 }
 0x360   :  { %1084 = vmatpush3.msra.mxu1 %v645_v57 }
 0x361   :  { %1085 = vmatprep.subr.mxu1 %v1181_v0 }
 0x362   :  { %1086 = vmatpush3.msra.mxu1 %v644_v58 }
 0x403   :  { %v494_v12 = vpop.f32.mrf.mxu1 }
 0x404   :  { %v495_v13 = vadd.f32 %v775_v11, %v494_v12 }
 0x405   :  { %v1019_v14 = vpop.f32.mrf.mxu1 }
 0x406   :  { %v498_v15 = vmax.f32 %v495_v13, 0.0 }
 0x408   :  { %v499_v16 = vrot.slane %v498_v15, 4 }
 0x40a   :  { %v500_v17 = vadd.f32 %v499_v16, %v498_v15 }
 0x40c   :  { %v501_v34 = vrot.slane %v500_v17, 2 }
 0x40e   :  { %v502_v35 = vadd.f32 %v501_v34, %v500_v17 }
 0x410   :  { %v503_v36 = vrot.slane %v502_v35, 1 }
 0x412   :  { %v504_v5 = vadd.f32 %v503_v36, %v502_v35  ;;  %v531_v35 = vld [vmem:[%s1525_s4 + $0xa] sm:$0x1] }
 0x414   :  { %v505_v37 = vmul.f32 0.125, %v504_v5 }
 0x416   :  { %v506_v38 = vsub.f32 %v498_v15, %v505_v37 }
 0x418   :  { %v507_v39 = vmul.f32 %v506_v38, %v506_v38 }
 0x41a   :  { %v508_v40 = vrot.slane %v507_v39, 4 }
 0x41c   :  { %v509_v41 = vadd.f32 %v508_v40, %v507_v39 }
 0x41e   :  { %v510_v42 = vrot.slane %v509_v41, 2 }
 0x420   :  { %v511_v43 = vadd.f32 %v510_v42, %v509_v41 }
 0x422   :  { %v512_v44 = vrot.slane %v511_v43, 1 }
 0x424   :  { %v513_v45 = vadd.f32 %v512_v44, %v511_v43 }
 0x426   :  { %v514_v46 = vmul.f32 0.125, %v513_v45  ;;  %v734_v45 = vld [vmem:[%s1525_s4 + $0x10] sm:$0x1] }
 0x427   :  { %vm735_vm1 = vcmp.eq.f32.partialorder %v734_v45, 1.0  ;;  %vm736_vm2 = vcmp.eq.f32.partialorder %v734_v45, 2.0 }
 0x428   :  { %v515_v47 = vadd.f32 1e-05, %v514_v46  ;;  %v1183_v46 = vmov 0  }
 0x42a   :  { %1104 = vrsqrt.f32 %v515_v47  ;;  %v738_v47 = vsel %vm735_vm1, 1, %v1183_v46 }
 0x437   :  { %v1105_v49 = vpop.eup %1104 }
 0x438   :  { %v517_v50 = vmul.f32 %v1105_v49, %v422_v48  ;;  %v745_v48 = vsel %vm736_vm2, 1, %v1183_v46  ;;  %v777_v49 = vld [vmem:[%s1525_s4 + $0x5] ss:$0 sm:$0xff] }
 0x43a   :  { %v518_v52 = vmul.f32 %v517_v50, %v505_v37  ;;  %v523_v53 = vrot.slane %v517_v50, %v1352_v59  ;;  %v532_v37 = vld [vmem:[%s1525_s4 + $0xf] sm:$0x1]  ;;  %v742_v50 = vrot.slane %v738_v47, %v1352_v59 }
 0x43c   :  { %v519_v18 = vsub.f32 %v423_v51, %v518_v52  ;;  %v524_v19 = vmul.f32 %v523_v53, %v498_v15  ;;  %v749_v51 = vrot.slane %v745_v48, %v1352_v59  ;;  %vm743_vm3 = vcmp.eq.s32.totalorder %v742_v50, 1 }
 0x43e   :  { %v528_v20 = vrot.slane %v519_v18, %v1352_v59  ;;  %vm1506_vm4 = vcmp.eq.s32.totalorder %v749_v51, 1 }
 0x440   :  { %v529_v21 = vadd.f32 %v528_v20, %v524_v19 }
 0x442   :  { %1053 = vmatmul.mubr.f32.vlgmr.msra.gmra.mxu0 %v529_v21  ;;  %v1469_v22 = vadd.f32 %v640_v10, %v529_v21 }
 0x502   :  { %v603_v61 = vpop.f32.mrf.mxu0 }
 0x503   :  { %v604_v62 = vadd.f32 %v776_v60, %v603_v61 }
 0x504   :  { %v1054_v63 = vpop.f32.mrf.mxu0 }
 0x505   :  { %v607_v1 = vmax.f32 %v604_v62, 0.0 }
 0x507   :  { %v608_v2 = vrot.slane %v607_v1, 4 }
 0x509   :  { %v609_v3 = vadd.f32 %v608_v2, %v607_v1 }
 0x50b   :  { %v610_v4 = vrot.slane %v609_v3, 2 }
 0x50d   :  { %v611_v6 = vadd.f32 %v610_v4, %v609_v3 }
 0x50f   :  { %v612_v7 = vrot.slane %v611_v6, 1 }
 0x511   :  { %v613_v8 = vadd.f32 %v612_v7, %v611_v6 }
 0x513   :  { %v614_v9 = vmul.f32 0.125, %v613_v8 }
 0x515   :  { %v615_v10 = vsub.f32 %v607_v1, %v614_v9 }
 0x517   :  { %v616_v11 = vmul.f32 %v615_v10, %v615_v10 }
 0x519   :  { %v617_v12 = vrot.slane %v616_v11, 4 }
 0x51b   :  { %v618_v0 = vadd.f32 %v617_v12, %v616_v11 }
 0x51d   :  { %v619_v13 = vrot.slane %v618_v0, 2 }
 0x51f   :  { %v620_v14 = vadd.f32 %v619_v13, %v618_v0 }
 0x521   :  { %v621_v15 = vrot.slane %v620_v14, 1 }
 0x523   :  { %v622_v16 = vadd.f32 %v621_v15, %v620_v14 }
 0x525   :  { %v623_v17 = vmul.f32 0.125, %v622_v16 }
 0x527   :  { %v624_v34 = vadd.f32 1e-05, %v623_v17 }
 0x529   :  { %1106 = vrsqrt.f32 %v624_v34 }
 0x536   :  { %v1107_v36 = vpop.eup %1106 }
 0x537   :  { %v626_v5 = vmul.f32 %v1107_v36, %v531_v35 }
 0x539   :  { %v627_v38 = vmul.f32 %v626_v5, %v614_v9  ;;  %v632_v39 = vrot.slane %v626_v5, %v1352_v59 }
 0x53b   :  { %v628_v40 = vsub.f32 %v532_v37, %v627_v38  ;;  %v633_v41 = vmul.f32 %v632_v39, %v607_v1 }
 0x53d   :  { %v637_v42 = vrot.slane %v628_v40, %v1352_v59 }
 0x53f   :  { %v638_v43 = vadd.f32 %v637_v42, %v633_v41 }
 0x541   :  { %v642_v44 = vadd.f32 %v1469_v22, %v638_v43 }
 0x543   :  { %1088 = vmatmul.mubr.f32.vlgmr.msra.gmra.mxu1 %v642_v44 }
 0x603   :  { %v730_v52 = vpop.f32.mrf.mxu1 }
 0x604   :  { %v731_v53 = vadd.f32 %v777_v49, %v730_v52 }
 0x605   :  { %v1089_v18 = vpop.f32.mrf.mxu1 }
 0x606   :  { %v737_v19 = vand.u32 2147483647, %v731_v53 }
 0x608   :  { %v744_v21 = vsel %vm743_vm3, %v737_v19, %v731_v53 }
 0x609   :  { %v751_v22 = vsel %vm1506_vm4, %v744_v21, -1e+30 }
 0x60a   :  { %752 = vmax.xlane.f32.xlu0 %v751_v22 }
 0x693   :  { %v753_v23 = vpop.xlane.xlu0 %752 }
 0x694   :  { %v754_v24 = vsub.f32 %v744_v21, %v753_v23 }
 0x696   :  { %v755_v25 = vsel %vm1506_vm4, %v754_v24, 0.0 }
 0x697   :  { %v756_v59 = vmul.f32 1.442695, %v755_v25 }
 0x699   :  { %1108 = vpow2.f32 %v756_v59 }
 0x6a6   :  { %v1109_v26 = vpop.eup %1108 }
 0x6a7   :  { %v758_v27 = vsel %vm1506_vm4, %v1109_v26, 0.0 }
 0x6a8   :  { %759 = vadd.xlane.f32.xlu0 %v758_v27 }
 0x731   :  { %v760_v28 = vpop.xlane.xlu0 %759 }
 0x732   :  { %1110 = vrcp.f32 %v760_v28 }
 0x73f   :  { %v1111_v29 = vpop.eup %1110 }
 0x740   :  { %v763_v30 = vmul.f32 %v1111_v29, %v758_v27 }
 0x742   :  { %v764_v31 = vsel %vm1506_vm4, %v763_v30, %v744_v21 }
 0x743   :  { %765 = vst [vmem:[%s1526_s5] sm:$0xff] %v764_v31 }
 0x744   :  { %770 = vsyncpa [#allocation3], 1 }
 0x745   :  { %771 = vsyncpa [#allocation5], 1 }

</bundles_post_ra>
